<compile_context>
chip_gen: v7x
topology: tpu7x:2x2x1
jax: 0.10.0
libtpu: 0.0.40
codegen_flags: <defaults>
</compile_context>

<pallas_src>
import functools
import math

import jax
import jax.numpy as jnp
from jax.experimental import pallas as pl
from jax.experimental.pallas import tpu as pltpu


def _make_kernel(label_smoothing, tgt_vocab_size, ignore_index, n_rows):
    confidence = 1.0 - label_smoothing
    smooth = label_smoothing / (tgt_vocab_size - 1)
    # xlogy-style constants: 0 * log(0) == 0 (matches torch.nn.KLDivLoss).
    log_conf = math.log(confidence) if confidence > 0.0 else 0.0
    log_smooth = math.log(smooth) if smooth > 0.0 else 0.0
    # sum_v true_dist[v] * log(true_dist[v])  -- identical for every row.
    c_const = confidence * log_conf + (tgt_vocab_size - 1) * smooth * log_smooth

    def kernel(out_ref, tgt_ref, true_dist_ref, rowloss_ref):
        i = pl.program_id(0)
        lp = out_ref[...].astype(jnp.float32)        # (TM, V) log-probs
        tgt = tgt_ref[...]                            # (TM, 1) int32
        tm, v = lp.shape

        vocab_ids = jax.lax.broadcasted_iota(jnp.int32, (tm, v), 1)
        onehot = vocab_ids == tgt                     # (TM, V) bool

        # Smoothed "true" distribution, written in the input dtype.
        true_dist_ref[...] = jnp.where(
            onehot, jnp.float32(confidence), jnp.float32(smooth)
        ).astype(true_dist_ref.dtype)

        # Closed-form KLDivLoss(reduction='none').sum(dim=1):
        #   row_loss = C - smooth * sum_v lp - (confidence - smooth) * lp[tgt]
        rowsum_lp = lp.sum(axis=1, keepdims=True)                      # (TM,1)
        lp_tgt = jnp.where(onehot, lp, 0.0).sum(axis=1, keepdims=True)  # (TM,1)
        row_loss = (
            jnp.float32(c_const)
            - jnp.float32(smooth) * rowsum_lp
            - jnp.float32(confidence - smooth) * lp_tgt
        )

        # Zero out ignore_index rows and (ragged) rows past the true N.
        row_ids = i * tm + jax.lax.broadcasted_iota(jnp.int32, (tm, 1), 0)
        valid = jnp.logical_and(tgt != ignore_index, row_ids < n_rows)
        rowloss_ref[...] = jnp.where(valid, row_loss, jnp.float32(0.0))

    return kernel


def _choose_tile_rows(n, v, itemsize, requested):
    # One pipeline buffer holds: lp tile + true_dist tile (+ tiny tgt/rowloss).
    per_row = v * (2 * itemsize) + 8
    budget = 16 * 1024 * 1024          # per-buffer; ~32 MiB with double buffering
    tm = min(int(requested), max(8, budget // per_row))
    tm = max(8, (tm // 8) * 8)         # keep sublane dim a multiple of 8
    n_pad8 = ((n + 7) // 8) * 8
    return min(tm, n_pad8)


@functools.partial(
    jax.jit,
    static_argnames=("label_smoothing", "tgt_vocab_size", "ignore_index", "tile_rows"),
)
def label_smoothing_kl_loss(
    output, target, *, label_smoothing, tgt_vocab_size, ignore_index=0, tile_rows=1024
):
    # Glue mirroring view(-1, V) / view(-1).  NOTE: no dtype upcast here -- the
    # kernel reads the native dtype (bf16 input => half the HBM traffic).
    out2d = output.reshape(-1, tgt_vocab_size)
    tgt2d = target.reshape(-1, 1).astype(jnp.int32)
    n = out2d.shape[0]

    tm = _choose_tile_rows(n, tgt_vocab_size, out2d.dtype.itemsize, tile_rows)
    grid = (pl.cdiv(n, tm),)

    kernel = _make_kernel(
        float(label_smoothing), int(tgt_vocab_size), int(ignore_index), n
    )

    true_dist, row_loss = pl.pallas_call(
        kernel,
        out_shape=(
            jax.ShapeDtypeStruct((n, tgt_vocab_size), out2d.dtype),
            jax.ShapeDtypeStruct((n, 1), jnp.float32),
        ),
        grid=grid,
        in_specs=[
            pl.BlockSpec((tm, tgt_vocab_size), lambda i: (i, 0)),
            pl.BlockSpec((tm, 1), lambda i: (i, 0)),
        ],
        out_specs=(
            pl.BlockSpec((tm, tgt_vocab_size), lambda i: (i, 0)),
            pl.BlockSpec((tm, 1), lambda i: (i, 0)),
        ),
        compiler_params=pltpu.CompilerParams(
            dimension_semantics=("parallel",),       # no cross-step carry
            vmem_limit_bytes=48 * 1024 * 1024,
        ),
    )(out2d, tgt2d)

    # Final scalar reduction over N per-row losses (negligible vs. N*V stream).
    non_pad = (tgt2d[:, 0] != ignore_index).astype(jnp.float32)
    # Matches PyTorch semantics: NaN if every row has target == ignore_index.
    loss = row_loss[:, 0].sum() / non_pad.sum()
    return true_dist, loss


def _reference(output, target, *, label_smoothing, tgt_vocab_size, ignore_index=0):
    # Pure-JAX reference mirroring the PyTorch module (xlogy semantics).
    out2d = output.reshape(-1, tgt_vocab_size).astype(jnp.float32)
    tgt = target.reshape(-1).astype(jnp.int32)
    confidence = 1.0 - label_smoothing
    smooth = label_smoothing / (tgt_vocab_size - 1)
    onehot = jax.nn.one_hot(tgt, tgt_vocab_size, dtype=jnp.bool_)
    true_dist = jnp.where(onehot, confidence, smooth).astype(jnp.float32)
    safe_td = jnp.maximum(true_dist, 1e-30)
    kl = jnp.where(true_dist > 0, true_dist * (jnp.log(safe_td) - out2d), 0.0)
    row_loss = kl.sum(axis=1)
    mask = (tgt != ignore_index).astype(jnp.float32)
    loss = (row_loss * mask).sum() / mask.sum()
    return true_dist.astype(output.dtype), loss


if __name__ == "__main__":
    # Module hyper-params (deterministic, in-script).
    label_smoothing = 0.1
    tgt_vocab_size = 32
    ignore_index = 0

    batch, seq = 2, 8  # -> N = 16 rows

    key = jax.random.PRNGKey(0)
    k_logits, k_tgt = jax.random.split(key)
    logits = jax.random.normal(k_logits, (batch, seq, tgt_vocab_size), jnp.float32)
    # `output` is expected to be log-probabilities (as fed to KLDivLoss).
    output = jax.nn.log_softmax(logits, axis=-1)
    target = jax.random.randint(k_tgt, (batch, seq), 0, tgt_vocab_size, jnp.int32)

    true_dist, loss = label_smoothing_kl_loss(
        output,
        target,
        label_smoothing=label_smoothing,
        tgt_vocab_size=tgt_vocab_size,
        ignore_index=ignore_index,
    )
    jax.block_until_ready((true_dist, loss))

    td_ref, loss_ref = _reference(
        output,
        target,
        label_smoothing=label_smoothing,
        tgt_vocab_size=tgt_vocab_size,
        ignore_index=ignore_index,
    )
    assert jnp.allclose(true_dist, td_ref, atol=1e-6), "true_dist mismatch"
    assert jnp.allclose(loss, loss_ref, rtol=1e-5, atol=1e-6), "loss mismatch"

    print("KERNEL_OK")
</pallas_src>

<mosaic_0001>
module attributes {stable_mosaic.version = 11 : i64} {
  func.func @kernel(%arg0: i32, %arg1: memref<16x32xf32, #tpu.memory_space<vmem>>, %arg2: memref<16x1xi32, #tpu.memory_space<vmem>>, %arg3: memref<16x32xf32, #tpu.memory_space<vmem>>, %arg4: memref<16x1xf32, #tpu.memory_space<vmem>>) attributes {dimension_semantics = [#tpu.dimension_semantics<parallel>], iteration_bounds = array<i64: 1>, scalar_prefetch = 0 : i64, scratch_operands = 0 : i64, tpu.core_type = #tpu.core_type<tc>, window_params = [{transform_indices = @transform_0, window_bounds = array<i64: 16, 32>}, {transform_indices = @transform_1, window_bounds = array<i64: 16, 1>}, {transform_indices = @transform_2, window_bounds = array<i64: 16, 32>}, {transform_indices = @transform_3, window_bounds = array<i64: 16, 1>}]} {
    %c0 = arith.constant 0 : index
    %c0_0 = arith.constant 0 : index
    %0 = vector.load %arg1[%c0, %c0_0] : memref<16x32xf32, #tpu.memory_space<vmem>>, vector<16x32xf32>
    %c0_1 = arith.constant 0 : index
    %c0_2 = arith.constant 0 : index
    %1 = vector.load %arg2[%c0_1, %c0_2] : memref<16x1xi32, #tpu.memory_space<vmem>>, vector<16x1xi32>
    %2 = tpu.iota {dimensions = array<i32: 1>} : vector<16x32xi32>
    %3 = vector.broadcast %1 : vector<16x1xi32> to vector<16x32xi32>
    %4 = arith.cmpi eq, %2, %3 : vector<16x32xi32>
    %cst = arith.constant 0.899999976 : f32
    %cst_3 = arith.constant 0.0032258064 : f32
    %5 = vector.broadcast %cst : f32 to vector<16x32xf32>
    %6 = vector.broadcast %cst_3 : f32 to vector<16x32xf32>
    %7 = arith.select %4, %5, %6 : vector<16x32xi1>, vector<16x32xf32>
    %c0_4 = arith.constant 0 : index
    %c0_5 = arith.constant 0 : index
    %8 = vector.load %arg3[%c0_4, %c0_5] : memref<16x32xf32, #tpu.memory_space<vmem>>, vector<16x32xf32>
    tpu.vector_store %arg3[%c0_4, %c0_5], %7 {strides = array<i32>} : memref<16x32xf32, #tpu.memory_space<vmem>>, vector<16x32xf32>,
    %cst_6 = arith.constant dense<0.000000e+00> : vector<16xf32>
    %9 = vector.multi_reduction <add>, %0, %cst_6 [1] : vector<16x32xf32> to vector<16xf32>
    %10 = vector.shape_cast %9 : vector<16xf32> to vector<16x1xf32>
    %cst_7 = arith.constant 0.000000e+00 : f32
    %11 = vector.broadcast %cst_7 : f32 to vector<16x32xf32>
    %12 = arith.select %4, %0, %11 : vector<16x32xi1>, vector<16x32xf32>
    %cst_8 = arith.constant dense<0.000000e+00> : vector<16xf32>
    %13 = vector.multi_reduction <add>, %12, %cst_8 [1] : vector<16x32xf32> to vector<16xf32>
    %14 = vector.shape_cast %13 : vector<16xf32> to vector<16x1xf32>
    %cst_9 = arith.constant 0.0032258064 : f32
    %15 = vector.broadcast %cst_9 : f32 to vector<16x1xf32>
    %16 = arith.mulf %15, %10 : vector<16x1xf32>
    %cst_10 = arith.constant -0.668481708 : f32
    %17 = vector.broadcast %cst_10 : f32 to vector<16x1xf32>
    %18 = arith.subf %17, %16 : vector<16x1xf32>
    %cst_11 = arith.constant 0.896774172 : f32
    %19 = vector.broadcast %cst_11 : f32 to vector<16x1xf32>
    %20 = arith.mulf %19, %14 : vector<16x1xf32>
    %21 = arith.subf %18, %20 : vector<16x1xf32>
    %c16_i32 = arith.constant 16 : i32
    %22 = arith.muli %arg0, %c16_i32 : i32
    %23 = tpu.iota {dimensions = array<i32: 0>} : vector<16x1xi32>
    %24 = vector.broadcast %22 : i32 to vector<16x1xi32>
    %25 = arith.addi %24, %23 : vector<16x1xi32>
    %c0_i32 = arith.constant 0 : i32
    %26 = vector.broadcast %c0_i32 : i32 to vector<16x1xi32>
    %27 = arith.cmpi ne, %1, %26 : vector<16x1xi32>
    %c16_i32_12 = arith.constant 16 : i32
    %28 = vector.broadcast %c16_i32_12 : i32 to vector<16x1xi32>
    %29 = arith.cmpi slt, %25, %28 : vector<16x1xi32>
    %30 = arith.andi %27, %29 : vector<16x1xi1>
    %cst_13 = arith.constant 0.000000e+00 : f32
    %31 = vector.broadcast %cst_13 : f32 to vector<16x1xf32>
    %32 = arith.select %30, %21, %31 : vector<16x1xi1>, vector<16x1xf32>
    %c0_14 = arith.constant 0 : index
    %c0_15 = arith.constant 0 : index
    %33 = vector.load %arg4[%c0_14, %c0_15] : memref<16x1xf32, #tpu.memory_space<vmem>>, vector<16x1xf32>
    tpu.vector_store %arg4[%c0_14, %c0_15], %32 {strides = array<i32>} : memref<16x1xf32, #tpu.memory_space<vmem>>, vector<16x1xf32>,
    return
  }
  func.func @transform_0(%arg0: i32) -> (i32, i32) {
    %c0_i32 = arith.constant 0 : i32
    %c0_i32_0 = arith.constant 0 : i32
    return %arg0, %c0_i32 : i32, i32
  }
  func.func @transform_1(%arg0: i32) -> (i32, i32) {
    %c0_i32 = arith.constant 0 : i32
    %c0_i32_0 = arith.constant 0 : i32
    return %arg0, %c0_i32 : i32, i32
  }
  func.func @transform_2(%arg0: i32) -> (i32, i32) {
    %c0_i32 = arith.constant 0 : i32
    %c0_i32_0 = arith.constant 0 : i32
    return %arg0, %c0_i32 : i32, i32
  }
  func.func @transform_3(%arg0: i32) -> (i32, i32) {
    %c0_i32 = arith.constant 0 : i32
    %c0_i32_0 = arith.constant 0 : i32
    return %arg0, %c0_i32 : i32, i32
  }
}

</mosaic_0001>

<bundles_post_ra>
// kernel: label_smoothing_kl_loss.1
= control target key start
LH: loop header
LB: loop body
LE: loop exit
PB: predicated region body
PF: predicated region fallthrough
CT: control target
= control target key end

     0   :  { %vm30_vm0 = vcmask 261120   ;;  %v123_v1 = vmov 0   ;;  %s184_s0 = inlined_call_operand.vmem [shape: f32[16,32], index: 0, kind: input, shape index: {}]   ;;  %s185_s1 = inlined_call_operand.vmem [shape: s32[16,1], index: 1, kind: input, shape index: {}]   ;;  %s186_s2 = inlined_call_operand.hbm [shape: f32[16,32], index: 2, kind: output, shape index: {0}]   ;;  %s187_s3 = inlined_call_operand.vmem [shape: f32[16,1], index: 3, kind: output, shape index: {1}]  }
   0x1   :  { %v16_v0 = vld [vmem:[%s185_s1] sm:$0xff]  ;;  %98 = vset.pattern.permute.xlu0 %v123_v1 }
   0x2   :  { %v14_v2 = vld [vmem:[%s184_s0] sm:$0xff] }
   0x3   :  { %9 = vsyncpa [#allocation3], 0  ;;  %21 = vperm.xlu0 %98, %v16_v0   ;;  %v33_v3 = vsel %vm30_vm0, %v14_v2, 0.0  ;;  %v17_v4 = vld [vmem:[%s185_s1 + $0x8] sm:$0xff]  ;;  %v18_v7 = vlaneseq  ;;  %v124_v10 = vmov 0.0032258064  }
   0x4   :  { %34 = vadd.xlane.f32.xlu1 %v33_v3  ;;  %v15_v5 = vld [vmem:[%s184_s0 + $0x8] sm:$0xff]  ;;  %s125_s0 = smov [#allocation2]  }
   0x5   :  { %v36_v6 = vsel %vm30_vm0, %v15_v5, 0.0  ;;  %v19_v8 = vand.u32 127, %v18_v7  ;;  %s78_s1 = sshll.u32 %s125_s0, 4  ;;  %s79_s1 = int_to_ptr.vmem [resolvable:$true] %s78_s1 }
   0x6   :  { %s99_s20 = scalar_lea.vmem %s79_s1, 256  ;;  %p104_p1 = scmp.lt.s32.totalorder %s79_s1, %s79_s1 }
   0x7   :  { %24 = vperm.xlu0 %98, %v17_v4   ;;  %p100_p0 = scmp.ne.s32.totalorder %s79_s1, %s99_s20  ;;  %p105_p2 = scmp.lt.s32.totalorder %s99_s20, %s99_s20 }
   0x8   :  { %37 = vadd.xlane.f32.xlu1 %v36_v6 }
   0x9   :  { %p106_p3 = por %p105_p2, %p104_p1 }
   0xb   :  { %p107_p4 = pnand %p106_p3, %p100_p0 }
  0x82   :  { %v22_v9 = vpop.permute.xlu0 %21 }
  0x83   :  { %vm26_vm1 = vcmp.eq.s32.totalorder %v19_v8, %v22_v9 }
  0x84   :  { %v28_v11 = vsel %vm26_vm1, 0.9, %v124_v10  ;;  %v39_v12 = vsel %vm26_vm1, %v14_v2, 0.0 }
  0x85   :  { %31 = vst.msk [vmem:[#allocation2] sm:$0xff] %vm30_vm0, %v28_v11  ;;  %v41_v13 = vsel %vm30_vm0, %v39_v12, 0.0 }
  0x86   :  { %v25_v14 = vpop.permute.xlu0 %24  ;;  %42 = vadd.xlane.f32.xlu0 %v41_v13 }
  0x87   :  { %vm27_vm2 = vcmp.eq.s32.totalorder %v19_v8, %v25_v14 }
  0x88   :  { %v29_v15 = vsel %vm27_vm2, 0.9, %v124_v10  ;;  %v40_v16 = vsel %vm27_vm2, %v15_v5, 0.0 }
  0x89   :  { %32 = vst.msk [vmem:[#allocation2 + $0x8] sm:$0xff] %vm30_vm0, %v29_v15  ;;  %v44_v17 = vsel %vm30_vm0, %v40_v16, 0.0 }
  0x8a   :  { %45 = vadd.xlane.f32.xlu1 %v44_v17 }
  0x8b   :  { %110 = shalt.err (!%p107_p4)
}
  0x8c   :  { %s111_s23 = scalar_lea.hbm %s186_s2, 256 }
  0x8d   :  { %p112_p5 = scmp.ne.s32.totalorder %s186_s2, %s111_s23  ;;  %p115_p6 = scmp.lt.u32.totalorder %s111_s23, %s186_s2 }
  0x8f   :  { %p117_p7 = pnand %p115_p6, %p112_p5 }
  0x91   :  { %120 = shalt.err (!%p117_p7)
}
  0x92   :  { %s126_s28 = smov 128   ;;  %s127_s29 = smov 8   ;;  %v35_v18 = vpop.xlane.xlu1 %34  ;;  %vm62_vm3 = vcmp.ne.s32.totalorder %v16_v0, 0  ;;  %vm70_vm4 = vcmask 7168   ;;  %vm63_vm5 = vcmp.ne.s32.totalorder %v17_v4, 0 }
  0x93   :  { %84 = dma.vmem_to_hbm [thread:$0]  %s79_s1, 256, %s186_s2, [#allocation3], %s126_s28, %s126_s28, %s127_s29   ;;  %v47_v19 = vmul.f32 0.0032258064, %v35_v18 }
  0x95   :  { %v49_v22 = vsub.f32 -0.6684817, %v47_v19 }
  0x96   :  { %v38_v20 = vpop.xlane.xlu1 %37 }
  0x97   :  { %v48_v24 = vmul.f32 0.0032258064, %v38_v20 }
  0x99   :  { %v50_v28 = vsub.f32 -0.6684817, %v48_v24 }
 0x113   :  { %v43_v21 = vpop.xlane.xlu0 %42 }
 0x114   :  { %v51_v23 = vmul.f32 0.8967742, %v43_v21 }
 0x116   :  { %v53_v25 = vsub.f32 %v49_v22, %v51_v23 }
 0x117   :  { %v46_v26 = vpop.xlane.xlu1 %45 }
 0x118   :  { %v68_v27 = vsel %vm62_vm3, %v53_v25, 0.0  ;;  %v52_v29 = vmul.f32 0.8967742, %v46_v26 }
 0x119   :  { %71 = vst.msk [vmem:[%s187_s3] sm:$0xff] %vm70_vm4, %v68_v27 }
 0x11a   :  { %v54_v30 = vsub.f32 %v50_v28, %v52_v29 }
 0x11c   :  { %v69_v31 = vsel %vm63_vm5, %v54_v30, 0.0 }
 0x11d   :  { %72 = vst.msk [vmem:[%s187_s3 + $0x8] sm:$0xff] %vm70_vm4, %v69_v31 }
 0x11e   :  { %121 = dma.done.wait [#allocation3], 256  }
 0x11f   :  { %122 = vsyncadd [#allocation3], 4294967040 }
 0x120   :  { %92 = vsyncpa [#allocation3], 1 }

</bundles_post_ra>
